<compile_context>
chip_gen: v5e
topology: v5e:2x2
jax: 0.10.0
libtpu: 0.0.40
codegen_flags: <defaults>
</compile_context>

<pallas_src>
import functools

import jax
import jax.numpy as jnp
from jax.experimental import pallas as pl
from jax.experimental.pallas import tpu as pltpu

DIM = 7            # nn.Linear out_features
IN_FEATURES = 32   # nn.Linear in_features


def _round_up(x, m):
    return ((x + m - 1) // m) * m


def _linear_kernel(x_ref, w_ref, b_ref, o_ref):
    # x_ref: [TB, 32]   w_ref: [32, DIM]   b_ref: [1, DIM]   o_ref: [TB, DIM]
    acc = jnp.dot(x_ref[...], w_ref[...], preferred_element_type=jnp.float32)
    o_ref[...] = (acc + b_ref[...]).astype(o_ref.dtype)


def pack_decoder_params(weight, bias):
    """Pre-pack PyTorch-layout params once (outside the hot path).

    weight: [DIM, 32] (PyTorch nn.Linear layout), bias: [DIM]
    returns w_t [32, DIM], b2d [1, DIM].
    """
    assert weight.shape == (DIM, IN_FEATURES)
    assert bias.shape == (DIM,)
    return jnp.asarray(weight).T, jnp.asarray(bias).reshape(1, DIM)


@functools.partial(jax.jit, static_argnames=("tb",))
def decoder_forward_packed(x, w_t, b2d, *, tb=8192):
    """x: [B, 32]; w_t: [32, DIM]; b2d: [1, DIM]. Returns [B, DIM]."""
    B = x.shape[0]
    dtype = x.dtype

    # Batch tile: multiple of 8 (sublane), capped by `tb`.  No padding of x:
    # Pallas handles the ragged final block (masked writeback) natively.
    TB = min(tb, _round_up(max(B, 1), 8))
    TB = _round_up(TB, 8)
    grid = (pl.cdiv(B, TB),)

    cost = pl.CostEstimate(
        flops=2 * B * IN_FEATURES * DIM,
        transcendentals=0,
        bytes_accessed=(B * IN_FEATURES * x.dtype.itemsize
                        + IN_FEATURES * DIM * w_t.dtype.itemsize
                        + DIM * b2d.dtype.itemsize
                        + B * DIM * dtype.itemsize),
    )

    return pl.pallas_call(
        _linear_kernel,
        out_shape=jax.ShapeDtypeStruct((B, DIM), dtype),
        grid_spec=pltpu.PrefetchScalarGridSpec(
            num_scalar_prefetch=0,
            grid=grid,
            in_specs=[
                pl.BlockSpec((TB, IN_FEATURES), lambda i: (i, 0)),    # x tile
                pl.BlockSpec((IN_FEATURES, DIM), lambda i: (0, 0)),   # resident W
                pl.BlockSpec((1, DIM), lambda i: (0, 0)),             # resident b
            ],
            out_specs=pl.BlockSpec((TB, DIM), lambda i: (i, 0)),
        ),
        compiler_params=pltpu.CompilerParams(
            dimension_semantics=("parallel",),
            # ~TB*2 KiB double-buffered footprint; 32 MiB keeps TB=8192 safe
            # even on v5e's 16 MiB default scoped VMEM.
            vmem_limit_bytes=32 * 1024 * 1024,
        ),
        cost_estimate=cost,
    )(x, w_t, b2d)


def decoder_forward(x, weight, bias, *, tb=8192):
    """Convenience wrapper taking PyTorch-layout params (weight [DIM,32], bias [DIM]).

    Note: for repeated calls, pack once with pack_decoder_params and call
    decoder_forward_packed to keep the transpose out of the hot path.
    """
    w_t, b2d = pack_decoder_params(weight, bias)
    return decoder_forward_packed(x, w_t, b2d, tb=tb)


def init_params(key):
    """Deterministic init matching nn.Linear(32, DIM) shapes (Kaiming-uniform-ish)."""
    kw, kb = jax.random.split(key)
    bound = 1.0 / jnp.sqrt(IN_FEATURES)
    weight = jax.random.uniform(kw, (DIM, IN_FEATURES), jnp.float32, -bound, bound)
    bias = jax.random.uniform(kb, (DIM,), jnp.float32, -bound, bound)
    return weight, bias


if __name__ == "__main__":
    key = jax.random.PRNGKey(0)
    kx, kp, kx2, kx3 = jax.random.split(key, 4)

    weight, bias = init_params(kp)
    # Pack weights once (transpose hoisted out of the hot path).
    w_t, b2d = pack_decoder_params(weight, bias)

    # Small test case consistent with the module (batch=8, hidden=32).
    B = 8
    x = jax.random.normal(kx, (B, IN_FEATURES), jnp.float32)
    out = jax.block_until_ready(decoder_forward_packed(x, w_t, b2d))
    ref = x @ weight.T + bias
    assert out.shape == (B, DIM)
    assert jnp.allclose(out, ref, atol=1e-5, rtol=1e-5)

    # Multi-step grid with a ragged final block (520 = 4*128 + 8).
    B2 = 520
    x2 = jax.random.normal(kx2, (B2, IN_FEATURES), jnp.float32)
    out2 = jax.block_until_ready(decoder_forward_packed(x2, w_t, b2d, tb=128))
    ref2 = x2 @ weight.T + bias
    assert out2.shape == (B2, DIM)
    assert jnp.allclose(out2, ref2, atol=1e-5, rtol=1e-5)

    # Batch not a multiple of 8 (single ragged block).
    B3 = 13
    x3 = jax.random.normal(kx3, (B3, IN_FEATURES), jnp.float32)
    out3 = jax.block_until_ready(decoder_forward_packed(x3, w_t, b2d))
    ref3 = x3 @ weight.T + bias
    assert out3.shape == (B3, DIM)
    assert jnp.allclose(out3, ref3, atol=1e-5, rtol=1e-5)

    print("KERNEL_OK")
</pallas_src>

<mosaic_0001>
module attributes {stable_mosaic.version = 11 : i64} {
  func.func @_linear_kernel(%arg0: i32, %arg1: memref<8x32xf32, #tpu.memory_space<vmem>>, %arg2: memref<32x7xf32, #tpu.memory_space<vmem>>, %arg3: memref<1x7xf32, #tpu.memory_space<vmem>>, %arg4: memref<8x7xf32, #tpu.memory_space<vmem>>) attributes {dimension_semantics = [#tpu.dimension_semantics<parallel>], iteration_bounds = array<i64: 1>, scalar_prefetch = 0 : i64, scratch_operands = 0 : i64, tpu.core_type = #tpu.core_type<tc>, window_params = [{transform_indices = @transform_0, window_bounds = array<i64: 8, 32>}, {pipeline_mode = #tpu.pipeline_mode<synchronous>, transform_indices = @transform_1, window_bounds = array<i64: 32, 7>}, {pipeline_mode = #tpu.pipeline_mode<synchronous>, transform_indices = @transform_2, window_bounds = array<i64: 1, 7>}, {transform_indices = @transform_3, window_bounds = array<i64: 8, 7>}]} {
    %c0 = arith.constant 0 : index
    %c0_0 = arith.constant 0 : index
    %0 = vector.load %arg1[%c0, %c0_0] : memref<8x32xf32, #tpu.memory_space<vmem>>, vector<8x32xf32>
    %c0_1 = arith.constant 0 : index
    %c0_2 = arith.constant 0 : index
    %1 = vector.load %arg2[%c0_1, %c0_2] : memref<32x7xf32, #tpu.memory_space<vmem>>, vector<32x7xf32>
    %cst = arith.constant dense<0.000000e+00> : vector<8x7xf32>
    %2 = tpu.matmul %0, %1, %cst {dimension_numbers = #tpu.dot_dimension_numbers<[1], [0], [0], [1], [0, 0, 1, 1], [], []>} : vector<8x32xf32>, vector<32x7xf32>, vector<8x7xf32> -> vector<8x7xf32>
    %c0_3 = arith.constant 0 : index
    %c0_4 = arith.constant 0 : index
    %3 = vector.load %arg3[%c0_3, %c0_4] : memref<1x7xf32, #tpu.memory_space<vmem>>, vector<1x7xf32>
    %4 = vector.broadcast %3 : vector<1x7xf32> to vector<8x7xf32>
    %5 = arith.addf %2, %4 : vector<8x7xf32>
    %c0_5 = arith.constant 0 : index
    %c0_6 = arith.constant 0 : index
    %6 = vector.load %arg4[%c0_5, %c0_6] : memref<8x7xf32, #tpu.memory_space<vmem>>, vector<8x7xf32>
    tpu.vector_store %arg4[%c0_5, %c0_6], %5 {strides = array<i32>} : memref<8x7xf32, #tpu.memory_space<vmem>>, vector<8x7xf32>,
    return
  }
  func.func @transform_0(%arg0: i32) -> (i32, i32) {
    %c0_i32 = arith.constant 0 : i32
    %c0_i32_0 = arith.constant 0 : i32
    return %arg0, %c0_i32 : i32, i32
  }
  func.func @transform_1(%arg0: i32) -> (i32, i32) {
    %c0_i32 = arith.constant 0 : i32
    %c0_i32_0 = arith.constant 0 : i32
    %c0_i32_1 = arith.constant 0 : i32
    return %c0_i32, %c0_i32_0 : i32, i32
  }
  func.func @transform_2(%arg0: i32) -> (i32, i32) {
    %c0_i32 = arith.constant 0 : i32
    %c0_i32_0 = arith.constant 0 : i32
    %c0_i32_1 = arith.constant 0 : i32
    return %c0_i32, %c0_i32_0 : i32, i32
  }
  func.func @transform_3(%arg0: i32) -> (i32, i32) {
    %c0_i32 = arith.constant 0 : i32
    %c0_i32_0 = arith.constant 0 : i32
    return %arg0, %c0_i32 : i32, i32
  }
}

</mosaic_0001>

<bundles_post_ra>
// kernel: decoder_forward_packed.1
= control target key start
LH: loop header
LB: loop body
LE: loop exit
PB: predicated region body
PF: predicated region fallthrough
CT: control target
= control target key end

     0   :  { %s137_s0 = inlined_call_operand.vmem [shape: f32[8,32], index: 0, kind: input, shape index: {}]   ;;  %s138_s1 = inlined_call_operand.vmem [shape: f32[32,7], index: 1, kind: input, shape index: {}]   ;;  %s139_s2 = inlined_call_operand.vmem [shape: f32[1,7], index: 2, kind: input, shape index: {}]   ;;  %s140_s3 = inlined_call_operand.hbm [shape: f32[8,7], index: 3, kind: output, shape index: {}]  }
   0x1   :  { %v19_v0 = vld [vmem:[%s138_s1 + $0x18] sm:$0xff]  ;;  %v18_v1 = vld [vmem:[%s138_s1 + $0x10] sm:$0xff]  ;;  %v17_v2 = vld [vmem:[%s138_s1 + $0x8] sm:$0xff] }
   0x2   :  { %40 = vmatpush.msra.mxu0 %v19_v0 }
   0x3   :  { %8 = vsyncpa [#allocation3], 0  ;;  %v16_v3 = vld [vmem:[%s138_s1] sm:$0xff]  ;;  %vm24_vm0 = vcmask 261120   ;;  %s95_s24 = smov [#allocation2]   ;;  %s57_s28 = sshll.u32 %s140_s3, 4  ;;  %s58_s28 = int_to_ptr.hbm [resolvable:$true] %s57_s28 }
   0x4   :  { %41 = vmatpush.msra.mxu0 %v18_v1  ;;  %v15_v4 = vld [vmem:[%s137_s0] sm:$0xff]  ;;  %s55_s25 = sshll.u32 %s95_s24, 4  ;;  %vm48_vm1 = vcmask 56320   ;;  %s56_s25 = int_to_ptr.vmem [resolvable:$true] %s55_s25 }
   0x5   :  { %v68_v5 = vld [vmem:[%s139_s2] ss:$0 sm:$0xff] }
   0x6   :  { %42 = vmatpush.msra.mxu0 %v17_v2 }
   0x8   :  { %43 = vmatpush.msra.mxu0 %v16_v3 }
   0x9   :  { %66 = vmatmul.msk.f32.vlgmr.msra.gmra.mxu0 %vm24_vm0, %v15_v4 }
  0x86   :  { %v45_v6 = vpop.f32.mrf.mxu0 }
  0x87   :  { %v46_v7 = vadd.f32 %v68_v5, %v45_v6 }
  0x89   :  { %49 = vst.msk [vmem:[#allocation2] sm:$0xff] %vm48_vm1, %v46_v7 }
  0x8a   :  { %60 = dma.vmem_to_hbm [thread:$0]  %s56_s25, 128, %s58_s28, [#allocation3]  }
  0x8b   :  { %93 = dma.done.wait [#allocation3], 128  }
  0x8c   :  { %94 = vsyncadd [#allocation3], 4294967168 }
  0x8d   :  { %65 = vsyncpa [#allocation3], 1 }

</bundles_post_ra>
